<compile_context>
chip_gen: v7x
topology: tpu7x:2x2x1
jax: 0.10.0
libtpu: 0.0.40
codegen_flags: <defaults>
</compile_context>

<pallas_src>
import jax
import jax.numpy as jnp
from jax.experimental import pallas as pl
from jax.experimental.pallas import tpu as pltpu

_HIDDEN = 64
_LANE = 128
_SUBLANE = 8


def _round_up(x, m):
    return ((x + m - 1) // m) * m


def qfunction_kernel(xT_ref, w1T_ref, b1_ref, w2T_ref, b2_ref, w3T_ref, b3_ref, outT_ref):
    # Batch on the lane axis; each layer contracts over the small sublane axis.
    # h1^T = relu(W1^T @ x^T + b1)          [hidden, tile_b], f32 MXU accumulate
    h1 = jnp.dot(w1T_ref[...], xT_ref[...], preferred_element_type=jnp.float32)
    h1 = jnp.maximum(h1 + b1_ref[...], 0.0).astype(jnp.bfloat16)
    # h2^T = relu(W2^T @ h1^T + b2)
    h2 = jnp.dot(w2T_ref[...], h1, preferred_element_type=jnp.float32)
    h2 = jnp.maximum(h2 + b2_ref[...], 0.0).astype(jnp.bfloat16)
    # out^T = W3^T @ h2^T + b3              [a_pad(=8), tile_b] lane-dense store
    out = jnp.dot(w3T_ref[...], h2, preferred_element_type=jnp.float32)
    outT_ref[...] = (out + b3_ref[...]).astype(outT_ref.dtype)


def prepare_params(params):
    """One-time weight prep (hoisted out of the per-call path): transpose to the
    batch-on-lanes layout, cast to bf16 (MXU-native), zero-pad the last layer's
    output rows from action_dim up to 8 sublanes."""
    hidden = params["w1"].shape[1]
    action_dim = params["w3"].shape[1]
    a_pad = _round_up(action_dim, _SUBLANE)

    w1T = params["w1"].T.astype(jnp.bfloat16)                    # [hidden, state_dim]
    w2T = params["w2"].T.astype(jnp.bfloat16)                    # [hidden, hidden]
    w3T = jnp.zeros((a_pad, hidden), jnp.bfloat16)
    w3T = w3T.at[:action_dim, :].set(params["w3"].T.astype(jnp.bfloat16))
    b1 = params["b1"].reshape(hidden, 1).astype(jnp.float32)
    b2 = params["b2"].reshape(hidden, 1).astype(jnp.float32)
    b3 = jnp.zeros((a_pad, 1), jnp.float32)
    b3 = b3.at[:action_dim, 0].set(params["b3"].reshape(-1).astype(jnp.float32))
    return {"w1T": w1T, "b1": b1, "w2T": w2T, "b2": b2, "w3T": w3T, "b3": b3}


def _choose_tile(batch, max_tile_b):
    """Batch-tile (lane) width. Large tiles amortize per-grid-step overhead; cap at
    half the batch (rounded to 128 lanes) so the 'parallel' grid keeps >= 2 steps
    and shards across both TensorCores on v7x. Small batches -> one 128-lane tile."""
    desired = _round_up(max_tile_b, _LANE)
    half = _round_up(-(-batch // 2), _LANE)
    return max(_LANE, min(desired, half))


def qfunction_forward(states, prepped, *, action_dim, max_tile_b=2048):
    """states: [B, state_dim] float32; prepped: output of prepare_params.
    Returns [B, action_dim] float32 Q-values."""
    B, state_dim = states.shape
    hidden = prepped["w1T"].shape[0]
    a_pad = prepped["w3T"].shape[0]

    tile_b = _choose_tile(B, max_tile_b)
    b_pad = _round_up(B, tile_b)
    grid_b = b_pad // tile_b

    # Batch on the lane axis: lane-dense streamed loads and lane-dense output
    # stores. The transpose/cast/pad of the tiny [state_dim, B] slab fuses into
    # one small XLA op under jit; padded columns are computed and then discarded.
    xT = states.T.astype(jnp.bfloat16)
    if b_pad != B:
        xT = jnp.pad(xT, ((0, 0), (0, b_pad - B)))

    resident = lambda shape: pl.BlockSpec(shape, lambda i: (0, 0))

    outT = pl.pallas_call(
        qfunction_kernel,
        out_shape=jax.ShapeDtypeStruct((a_pad, b_pad), jnp.float32),
        grid=(grid_b,),
        in_specs=[
            pl.BlockSpec((state_dim, tile_b), lambda i: (0, i)),  # x^T streamed
            resident((hidden, state_dim)),                        # W1^T (VMEM-resident)
            resident((hidden, 1)),                                # b1
            resident((hidden, hidden)),                           # W2^T
            resident((hidden, 1)),                                # b2
            resident((a_pad, hidden)),                            # W3^T (sublane-padded)
            resident((a_pad, 1)),                                 # b3
        ],
        out_specs=pl.BlockSpec((a_pad, tile_b), lambda i: (0, i)),
        compiler_params=pltpu.CompilerParams(
            dimension_semantics=("parallel",),
        ),
    )(xT, prepped["w1T"], prepped["b1"], prepped["w2T"], prepped["b2"],
      prepped["w3T"], prepped["b3"])

    # Tiny [action_dim, B] slice + transpose back to the module's [B, action_dim].
    return outT[:action_dim, :B].T


def init_params(key, state_dim, action_dim, hidden=_HIDDEN):
    """Deterministic init mimicking nn.Linear default (uniform(-1/sqrt(fan_in), +))."""
    keys = jax.random.split(key, 6)

    def linear(kw, kb, fan_in, fan_out):
        bound = 1.0 / jnp.sqrt(jnp.float32(fan_in))
        w = jax.random.uniform(kw, (fan_in, fan_out), jnp.float32, -bound, bound)
        b = jax.random.uniform(kb, (1, fan_out), jnp.float32, -bound, bound)
        return w, b

    w1, b1 = linear(keys[0], keys[1], state_dim, hidden)
    w2, b2 = linear(keys[2], keys[3], hidden, hidden)
    w3, b3 = linear(keys[4], keys[5], hidden, action_dim)
    return {"w1": w1, "b1": b1, "w2": w2, "b2": b2, "w3": w3, "b3": b3}


def reference_forward(states, p):
    """Pure-JAX reference using the same bf16 operand rounding / f32 accumulation."""
    q = lambda a: a.astype(jnp.bfloat16).astype(jnp.float32)
    h = jnp.maximum(q(states) @ q(p["w1"]) + p["b1"], 0.0)
    h = jnp.maximum(q(h) @ q(p["w2"]) + p["b2"], 0.0)
    return q(h) @ q(p["w3"]) + p["b3"]


if __name__ == "__main__":
    # Acrobot-v1: observation dim = 6, action dim = 3 (gym env not constructed here).
    state_dim, action_dim = 6, 3

    key = jax.random.PRNGKey(0)
    k_params, k_small, k_big = jax.random.split(key, 3)
    params = init_params(k_params, state_dim, action_dim)
    prepped = prepare_params(params)            # one-time weight prep (hoisted)

    fwd = jax.jit(qfunction_forward, static_argnames=("action_dim", "max_tile_b"))

    # Small batch (typical RL inference shape).
    states = jax.random.normal(k_small, (8, state_dim), jnp.float32)
    q_small = jax.block_until_ready(fwd(states, prepped, action_dim=action_dim))
    assert q_small.shape == (8, action_dim)
    assert jnp.allclose(q_small, reference_forward(states, params), atol=1e-2, rtol=1e-2)

    # Ragged multi-tile batch: exercises batch padding and a >1-step "parallel" grid.
    states_big = jax.random.normal(k_big, (300, state_dim), jnp.float32)
    q_big = jax.block_until_ready(fwd(states_big, prepped, action_dim=action_dim))
    assert q_big.shape == (300, action_dim)
    assert jnp.allclose(q_big, reference_forward(states_big, params), atol=1e-2, rtol=1e-2)

    print("KERNEL_OK")
</pallas_src>

<mosaic_0001>
module attributes {stable_mosaic.version = 11 : i64} {
  func.func @qfunction_kernel(%arg0: i32, %arg1: memref<6x128xbf16, #tpu.memory_space<vmem>>, %arg2: memref<64x6xbf16, #tpu.memory_space<vmem>>, %arg3: memref<64x1xf32, #tpu.memory_space<vmem>>, %arg4: memref<64x64xbf16, #tpu.memory_space<vmem>>, %arg5: memref<64x1xf32, #tpu.memory_space<vmem>>, %arg6: memref<8x64xbf16, #tpu.memory_space<vmem>>, %arg7: memref<8x1xf32, #tpu.memory_space<vmem>>, %arg8: memref<8x128xf32, #tpu.memory_space<vmem>>) attributes {dimension_semantics = [#tpu.dimension_semantics<parallel>], iteration_bounds = array<i64: 1>, scalar_prefetch = 0 : i64, scratch_operands = 0 : i64, tpu.core_type = #tpu.core_type<tc>, window_params = [{transform_indices = @transform_0, window_bounds = array<i64: 6, 128>}, {pipeline_mode = #tpu.pipeline_mode<synchronous>, transform_indices = @transform_1, window_bounds = array<i64: 64, 6>}, {pipeline_mode = #tpu.pipeline_mode<synchronous>, transform_indices = @transform_2, window_bounds = array<i64: 64, 1>}, {pipeline_mode = #tpu.pipeline_mode<synchronous>, transform_indices = @transform_3, window_bounds = array<i64: 64, 64>}, {pipeline_mode = #tpu.pipeline_mode<synchronous>, transform_indices = @transform_4, window_bounds = array<i64: 64, 1>}, {pipeline_mode = #tpu.pipeline_mode<synchronous>, transform_indices = @transform_5, window_bounds = array<i64: 8, 64>}, {pipeline_mode = #tpu.pipeline_mode<synchronous>, transform_indices = @transform_6, window_bounds = array<i64: 8, 1>}, {transform_indices = @transform_7, window_bounds = array<i64: 8, 128>}]} {
    %c0 = arith.constant 0 : index
    %c0_0 = arith.constant 0 : index
    %0 = vector.load %arg2[%c0, %c0_0] : memref<64x6xbf16, #tpu.memory_space<vmem>>, vector<64x6xbf16>
    %c0_1 = arith.constant 0 : index
    %c0_2 = arith.constant 0 : index
    %1 = vector.load %arg1[%c0_1, %c0_2] : memref<6x128xbf16, #tpu.memory_space<vmem>>, vector<6x128xbf16>
    %cst = arith.constant dense<0.000000e+00> : vector<64x128xf32>
    %2 = tpu.matmul %0, %1, %cst {dimension_numbers = #tpu.dot_dimension_numbers<[1], [0], [0], [1], [0, 0, 1, 1], [], []>} : vector<64x6xbf16>, vector<6x128xbf16>, vector<64x128xf32> -> vector<64x128xf32>
    %c0_3 = arith.constant 0 : index
    %c0_4 = arith.constant 0 : index
    %3 = vector.load %arg3[%c0_3, %c0_4] : memref<64x1xf32, #tpu.memory_space<vmem>>, vector<64x1xf32>
    %4 = vector.broadcast %3 : vector<64x1xf32> to vector<64x128xf32>
    %5 = arith.addf %2, %4 : vector<64x128xf32>
    %cst_5 = arith.constant 0.000000e+00 : f32
    %6 = vector.broadcast %cst_5 : f32 to vector<64x128xf32>
    %7 = arith.maximumf %5, %6 : vector<64x128xf32>
    %8 = arith.truncf %7 : vector<64x128xf32> to vector<64x128xbf16>
    %c0_6 = arith.constant 0 : index
    %c0_7 = arith.constant 0 : index
    %9 = vector.load %arg4[%c0_6, %c0_7] : memref<64x64xbf16, #tpu.memory_space<vmem>>, vector<64x64xbf16>
    %cst_8 = arith.constant dense<0.000000e+00> : vector<64x128xf32>
    %10 = tpu.matmul %9, %8, %cst_8 {dimension_numbers = #tpu.dot_dimension_numbers<[1], [0], [0], [1], [0, 0, 1, 1], [], []>} : vector<64x64xbf16>, vector<64x128xbf16>, vector<64x128xf32> -> vector<64x128xf32>
    %c0_9 = arith.constant 0 : index
    %c0_10 = arith.constant 0 : index
    %11 = vector.load %arg5[%c0_9, %c0_10] : memref<64x1xf32, #tpu.memory_space<vmem>>, vector<64x1xf32>
    %12 = vector.broadcast %11 : vector<64x1xf32> to vector<64x128xf32>
    %13 = arith.addf %10, %12 : vector<64x128xf32>
    %cst_11 = arith.constant 0.000000e+00 : f32
    %14 = vector.broadcast %cst_11 : f32 to vector<64x128xf32>
    %15 = arith.maximumf %13, %14 : vector<64x128xf32>
    %16 = arith.truncf %15 : vector<64x128xf32> to vector<64x128xbf16>
    %c0_12 = arith.constant 0 : index
    %c0_13 = arith.constant 0 : index
    %17 = vector.load %arg6[%c0_12, %c0_13] : memref<8x64xbf16, #tpu.memory_space<vmem>>, vector<8x64xbf16>
    %cst_14 = arith.constant dense<0.000000e+00> : vector<8x128xf32>
    %18 = tpu.matmul %17, %16, %cst_14 {dimension_numbers = #tpu.dot_dimension_numbers<[1], [0], [0], [1], [0, 0, 1, 1], [], []>} : vector<8x64xbf16>, vector<64x128xbf16>, vector<8x128xf32> -> vector<8x128xf32>
    %c0_15 = arith.constant 0 : index
    %c0_16 = arith.constant 0 : index
    %19 = vector.load %arg7[%c0_15, %c0_16] : memref<8x1xf32, #tpu.memory_space<vmem>>, vector<8x1xf32>
    %20 = vector.broadcast %19 : vector<8x1xf32> to vector<8x128xf32>
    %21 = arith.addf %18, %20 : vector<8x128xf32>
    %c0_17 = arith.constant 0 : index
    %c0_18 = arith.constant 0 : index
    %22 = vector.load %arg8[%c0_17, %c0_18] : memref<8x128xf32, #tpu.memory_space<vmem>>, vector<8x128xf32>
    tpu.vector_store %arg8[%c0_17, %c0_18], %21 {strides = array<i32>} : memref<8x128xf32, #tpu.memory_space<vmem>>, vector<8x128xf32>,
    return
  }
  func.func @transform_0(%arg0: i32) -> (i32, i32) {
    %c0_i32 = arith.constant 0 : i32
    %c0_i32_0 = arith.constant 0 : i32
    return %c0_i32, %arg0 : i32, i32
  }
  func.func @transform_1(%arg0: i32) -> (i32, i32) {
    %c0_i32 = arith.constant 0 : i32
    %c0_i32_0 = arith.constant 0 : i32
    %c0_i32_1 = arith.constant 0 : i32
    return %c0_i32, %c0_i32_0 : i32, i32
  }
  func.func @transform_2(%arg0: i32) -> (i32, i32) {
    %c0_i32 = arith.constant 0 : i32
    %c0_i32_0 = arith.constant 0 : i32
    %c0_i32_1 = arith.constant 0 : i32
    return %c0_i32, %c0_i32_0 : i32, i32
  }
  func.func @transform_3(%arg0: i32) -> (i32, i32) {
    %c0_i32 = arith.constant 0 : i32
    %c0_i32_0 = arith.constant 0 : i32
    %c0_i32_1 = arith.constant 0 : i32
    return %c0_i32, %c0_i32_0 : i32, i32
  }
  func.func @transform_4(%arg0: i32) -> (i32, i32) {
    %c0_i32 = arith.constant 0 : i32
    %c0_i32_0 = arith.constant 0 : i32
    %c0_i32_1 = arith.constant 0 : i32
    return %c0_i32, %c0_i32_0 : i32, i32
  }
  func.func @transform_5(%arg0: i32) -> (i32, i32) {
    %c0_i32 = arith.constant 0 : i32
    %c0_i32_0 = arith.constant 0 : i32
    %c0_i32_1 = arith.constant 0 : i32
    return %c0_i32, %c0_i32_0 : i32, i32
  }
  func.func @transform_6(%arg0: i32) -> (i32, i32) {
    %c0_i32 = arith.constant 0 : i32
    %c0_i32_0 = arith.constant 0 : i32
    %c0_i32_1 = arith.constant 0 : i32
    return %c0_i32, %c0_i32_0 : i32, i32
  }
  func.func @transform_7(%arg0: i32) -> (i32, i32) {
    %c0_i32 = arith.constant 0 : i32
    %c0_i32_0 = arith.constant 0 : i32
    return %c0_i32, %arg0 : i32, i32
  }
}

</mosaic_0001>

<bundles_post_ra>
// kernel: qfunction_forward.1
= control target key start
LH: loop header
LB: loop body
LE: loop exit
PB: predicated region body
PF: predicated region fallthrough
CT: control target
= control target key end

     0   :  { %vm117_vm0 = vcmask 1042432   ;;  %vm104_vm1 = vcmask 48128   ;;  %v506_v1 = vmov 0   ;;  %vm274_vm2 = vcmask 523264   ;;  %s642_s0 = inlined_call_operand.vmem [shape: bf16[6,128], index: 0, kind: input, shape index: {}]   ;;  %s643_s1 = inlined_call_operand.vmem [shape: bf16[64,6], index: 1, kind: input, shape index: {}]   ;;  %s644_s2 = inlined_call_operand.vmem [shape: f32[64,1], index: 2, kind: input, shape index: {}]   ;;  %s645_s4 = inlined_call_operand.vmem [shape: f32[64,1], index: 4, kind: input, shape index: {}]   ;;  %s646_s6 = inlined_call_operand.vmem [shape: f32[8,1], index: 6, kind: input, shape index: {}]   ;;  %s647_s3 = inlined_call_operand.vmem [shape: bf16[64,64], index: 3, kind: input, shape index: {}]   ;;  %s648_s5 = inlined_call_operand.vmem [shape: bf16[8,64], index: 5, kind: input, shape index: {}]   ;;  %s649_s7 = inlined_call_operand.vmem [shape: f32[8,128], index: 7, kind: output, shape index: {}]  }
   0x1   :  { %v35_v0 = vld [vmem:[%s642_s0] sm:$0x7]  ;;  %496 = vset.pattern.permute.xlu0 %v506_v1  ;;  %497 = vset.pattern.permute.xlu1 %v506_v1  ;;  %v499_v4 = vld [vmem:[%s643_s1 + $0x8] sm:$0xff]   ;;  %v500_v5 = vld [vmem:[%s643_s1 + $0x10] sm:$0xff]   ;;  %vm508_vm3 = vmmov 0  }
   0x2   :  { %492 = vmatprep.subr.msk.bf16.mxu0 %vm117_vm0, %v35_v0  ;;  %v119_v2 = vsel %vm117_vm0, %v35_v0, 0  ;;  %v498_v3 = vld [vmem:[%s643_s1] sm:$0xff]   ;;  %v38_v7 = vld [vmem:[%s644_s2 + $0x10] sm:$0xff]  ;;  %v37_v8 = vld [vmem:[%s644_s2 + $0x8] sm:$0xff]  ;;  %v507_v0 = vmov 0.0  }
   0x3   :  { %455 = vmatpush3.bf16.msra.mxu0 %v119_v2  ;;  %456 = vmatprep.mubr.msk.bf16.mxu0 %vm104_vm1, %v498_v3  ;;  %v36_v6 = vld [vmem:[%s644_s2] sm:$0xff]  ;;  %v39_v9 = vld [vmem:[%s644_s2 + $0x18] sm:$0xff]  ;;  %v41_v12 = vld [vmem:[%s644_s2 + $0x28] sm:$0xff] }
   0x4   :  { %46 = vperm.xlu0 %496, %v36_v6   ;;  %56 = vperm.xlu1 %497, %v38_v7   ;;  %v501_v10 = vld [vmem:[%s643_s1 + $0x18] sm:$0xff]   ;;  %v40_v11 = vld [vmem:[%s644_s2 + $0x20] sm:$0xff]  ;;  %v42_v13 = vld [vmem:[%s644_s2 + $0x30] sm:$0xff] }
   0x5   :  { %v43_v14 = vld [vmem:[%s644_s2 + $0x38] sm:$0xff]  ;;  %v206_v15 = vld [vmem:[%s645_s4] sm:$0xff]  ;;  %v207_v16 = vld [vmem:[%s645_s4 + $0x8] sm:$0xff]  ;;  %480 = vmatprep.subr.bf16.mxu0 %v507_v0 }
   0x6   :  { %457 = vmatmul.mubr.msk.bf16.vlgmr.msra.gmra.mrb[0].mxu0 %vm104_vm1, %v499_v4  ;;  %v208_v17 = vld [vmem:[%s645_s4 + $0x10] sm:$0xff]  ;;  %v209_v18 = vld [vmem:[%s645_s4 + $0x18] sm:$0xff]  ;;  %v210_v19 = vld [vmem:[%s645_s4 + $0x20] sm:$0xff] }
   0x7   :  { %460 = vmatprep.mubr.msk.bf16.mxu0 %vm104_vm1, %v500_v5  ;;  %v211_v20 = vld [vmem:[%s645_s4 + $0x28] sm:$0xff]  ;;  %v212_v21 = vld [vmem:[%s645_s4 + $0x30] sm:$0xff]  ;;  %v213_v22 = vld [vmem:[%s645_s4 + $0x38] sm:$0xff] }
   0x8   :  { %51 = vperm.xlu0 %496, %v37_v8   ;;  %61 = vperm.xlu1 %497, %v39_v9   ;;  %v365_v23 = vld [vmem:[%s646_s6] sm:$0xff]  ;;  %v503_v61 = vld [vmem:[%s647_s3 + $0x8] sm:$0xff]   ;;  %v504_v62 = vld [vmem:[%s647_s3 + $0x10] sm:$0xff]  }
   0x9   :  { %v502_v24 = vld [vmem:[%s647_s3] sm:$0xff]   ;;  %v505_v63 = vld [vmem:[%s647_s3 + $0x18] sm:$0xff]  }
   0xa   :  { %472 = vmatprep.mubr.msk.bf16.mxu1 %vm274_vm2, %v502_v24 }
   0xc   :  { %66 = vperm.xlu0 %496, %v40_v11   ;;  %71 = vperm.xlu1 %497, %v41_v12  }
   0xe   :  { %461 = vmatmul.mubr.msk.bf16.gmra.mrb[4].mxu0 %vm104_vm1, %v501_v10 }
   0xf   :  { %488 = vmatprep.mubr.msk.bf16.mxu0 %vm508_vm3, %v507_v0 }
  0x10   :  { %76 = vperm.xlu0 %496, %v42_v13   ;;  %81 = vperm.xlu1 %497, %v43_v14  }
  0x14   :  { %216 = vperm.xlu0 %496, %v206_v15   ;;  %221 = vperm.xlu1 %497, %v207_v16  }
  0x18   :  { %226 = vperm.xlu0 %496, %v208_v17   ;;  %231 = vperm.xlu1 %497, %v209_v18  }
  0x1c   :  { %236 = vperm.xlu0 %496, %v210_v19   ;;  %241 = vperm.xlu1 %497, %v211_v20  }
  0x20   :  { %246 = vperm.xlu0 %496, %v212_v21   ;;  %251 = vperm.xlu1 %497, %v213_v22  }
  0x24   :  { %368 = vperm.xlu0 %496, %v365_v23  }
  0x83   :  { %v47_v25 = vpop.permute.xlu0 %46  ;;  %v57_v26 = vpop.permute.xlu1 %56 }
  0x87   :  { %v52_v27 = vpop.permute.xlu0 %51  ;;  %v62_v28 = vpop.permute.xlu1 %61 }
  0x8b   :  { %v67_v32 = vpop.permute.xlu0 %66  ;;  %v72_v37 = vpop.permute.xlu1 %71 }
  0x8f   :  { %v77_v44 = vpop.permute.xlu0 %76  ;;  %v82_v49 = vpop.permute.xlu1 %81 }
  0x93   :  { %v217_v1 = vpop.permute.xlu0 %216  ;;  %v222_v2 = vpop.permute.xlu1 %221 }
  0x97   :  { %v227_v3 = vpop.permute.xlu0 %226  ;;  %v232_v4 = vpop.permute.xlu1 %231 }
  0x9b   :  { %v237_v8 = vpop.permute.xlu0 %236  ;;  %v242_v13 = vpop.permute.xlu1 %241 }
  0x9f   :  { %v247_v20 = vpop.permute.xlu0 %246 }
  0xd9   :  { %v458_v29 = vpop.f32.mrb[0].mxu0 }
  0xda   :  { %v164_v30 = vadd.f32 %v458_v29, %v57_v26  ;;  %v155_v31 = vpop.f32.mrb[1].mxu0 }
  0xdb   :  { %v156_v33 = vadd.f32 %v155_v31, %v47_v25  ;;  %v459_v34 = vpop.f32.mrb[2].mxu0  ;;  %v252_v25 = vpop.permute.xlu1 %251 }
  0xdc   :  { %v167_v35 = vadd.f32 %v459_v34, %v62_v28  ;;  %v158_v36 = vpop.f32.mrb[3].mxu0  ;;  %v188_v39 = vmax.f32 %v164_v30, 0.0 }
  0xdd   :  { %v159_v38 = vadd.f32 %v158_v36, %v52_v27  ;;  %v186_v41 = vmax.f32 %v156_v33, 0.0 }
  0xde   :  { %v189_v40 = vmax.f32 %v167_v35, 0.0 }
  0xdf   :  { %v187_v42 = vmax.f32 %v159_v38, 0.0  ;;  %v369_v38 = vpop.permute.xlu0 %368 }
  0xe0   :  { %v195_v43 = vpack.c.bf16 %v189_v40, %v188_v39 }
  0xe1   :  { %v462_v45 = vpop.f32.mrb[4].mxu0  ;;  %v194_v46 = vpack.c.bf16 %v187_v42, %v186_v41 }
  0xe2   :  { %v180_v47 = vadd.f32 %v462_v45, %v77_v44  ;;  %v171_v48 = vpop.f32.mrb[5].mxu0 }
  0xe3   :  { %v172_v50 = vadd.f32 %v171_v48, %v67_v32  ;;  %v463_v51 = vpop.f32.mrb[6].mxu0  ;;  %464 = vmatprep.subr.bf16.mxu1 %v194_v46 }
  0xe4   :  { %v183_v52 = vadd.f32 %v463_v51, %v82_v49  ;;  %v174_v53 = vpop.f32.mrb[7].mxu0  ;;  %465 = vmatpush3.bf16.msra.mxu1 %v194_v46  ;;  %v192_v55 = vmax.f32 %v180_v47, 0.0 }
  0xe5   :  { %v175_v54 = vadd.f32 %v174_v53, %v72_v37  ;;  %466 = vmatprep.subr.bf16.mxu1 %v195_v43  ;;  %v190_v57 = vmax.f32 %v172_v50, 0.0  ;;  %v364_v37 = vld [vmem:[%s648_s5] sm:$0xf] }
  0xe6   :  { %v193_v56 = vmax.f32 %v183_v52, 0.0 }
  0xe7   :  { %v191_v58 = vmax.f32 %v175_v54, 0.0 }
  0xe8   :  { %v197_v59 = vpack.c.bf16 %v193_v56, %v192_v55  ;;  %467 = vmatpush3.bf16.msra.mxu1 %v195_v43 }
  0xe9   :  { %v196_v60 = vpack.c.bf16 %v191_v58, %v190_v57 }
  0xeb   :  { %468 = vmatprep.subr.bf16.mxu1 %v196_v60 }
  0xec   :  { %469 = vmatpush3.bf16.msra.mxu1 %v196_v60 }
  0xed   :  { %470 = vmatprep.subr.bf16.mxu1 %v197_v59 }
  0xf0   :  { %471 = vmatpush3.bf16.msra.mxu1 %v197_v59 }
  0xf3   :  { %473 = vmatmul.mubr.msk.bf16.vlgmr.msra.gmra.mrb[0].mxu1 %vm274_vm2, %v503_v61 }
  0xf4   :  { %476 = vmatprep.mubr.msk.bf16.mxu1 %vm274_vm2, %v504_v62 }
  0xfb   :  { %477 = vmatmul.mubr.msk.bf16.gmra.mrb[4].mxu1 %vm274_vm2, %v505_v63 }
 0x1c6   :  { %v474_v5 = vpop.f32.mrb[0].mxu1 }
 0x1c7   :  { %v330_v6 = vadd.f32 %v474_v5, %v227_v3  ;;  %v321_v7 = vpop.f32.mrb[1].mxu1 }
 0x1c8   :  { %v322_v9 = vadd.f32 %v321_v7, %v217_v1  ;;  %v475_v10 = vpop.f32.mrb[2].mxu1 }
 0x1c9   :  { %v333_v11 = vadd.f32 %v475_v10, %v232_v4  ;;  %v324_v12 = vpop.f32.mrb[3].mxu1  ;;  %v354_v15 = vmax.f32 %v330_v6, 0.0 }
 0x1ca   :  { %v325_v14 = vadd.f32 %v324_v12, %v222_v2  ;;  %v352_v17 = vmax.f32 %v322_v9, 0.0 }
 0x1cb   :  { %v355_v16 = vmax.f32 %v333_v11, 0.0 }
 0x1cc   :  { %v353_v18 = vmax.f32 %v325_v14, 0.0 }
 0x1cd   :  { %v361_v19 = vpack.c.bf16 %v355_v16, %v354_v15 }
 0x1ce   :  { %v360_v21 = vpack.c.bf16 %v353_v18, %v352_v17  ;;  %v478_v22 = vpop.f32.mrb[4].mxu1 }
 0x1cf   :  { %v346_v23 = vadd.f32 %v478_v22, %v247_v20  ;;  %v337_v24 = vpop.f32.mrb[5].mxu1 }
 0x1d0   :  { %v338_v26 = vadd.f32 %v337_v24, %v237_v8  ;;  %v479_v27 = vpop.f32.mrb[6].mxu1  ;;  %481 = vmatpush3.bf16.msra.mxu0 %v360_v21 }
 0x1d1   :  { %v349_v28 = vadd.f32 %v479_v27, %v252_v25  ;;  %v340_v29 = vpop.f32.mrb[7].mxu1  ;;  %482 = vmatprep.subr.bf16.mxu0 %v507_v0  ;;  %v358_v31 = vmax.f32 %v346_v23, 0.0 }
 0x1d2   :  { %v341_v30 = vadd.f32 %v340_v29, %v242_v13  ;;  %v356_v33 = vmax.f32 %v338_v26, 0.0 }
 0x1d3   :  { %v359_v32 = vmax.f32 %v349_v28, 0.0 }
 0x1d4   :  { %v357_v34 = vmax.f32 %v341_v30, 0.0  ;;  %483 = vmatpush3.bf16.msra.mxu0 %v361_v19 }
 0x1d5   :  { %v363_v35 = vpack.c.bf16 %v359_v32, %v358_v31  ;;  %484 = vmatprep.subr.bf16.mxu0 %v507_v0 }
 0x1d6   :  { %v362_v36 = vpack.c.bf16 %v357_v34, %v356_v33 }
 0x1d8   :  { %485 = vmatpush3.bf16.msra.mxu0 %v362_v36 }
 0x1d9   :  { %486 = vmatprep.subr.bf16.mxu0 %v507_v0 }
 0x1dc   :  { %487 = vmatpush3.bf16.msra.mxu0 %v363_v35 }
 0x1df   :  { %489 = vmatmul.mubr.msk.bf16.vlgmr.msra.gmra.mrb[8].mxu0 %vm274_vm2, %v364_v37 }
 0x2b2   :  { %v408_v39 = vpop.f32.mrb[8].mxu0 }
 0x2b3   :  { %v409_v40 = vadd.f32 %v408_v39, %v369_v38  ;;  %v490_v41 = vpop.f32.mrb[9].mxu0 }
 0x2b4   :  { %v411_v42 = vpop.f32.mrb[10].mxu0 }
 0x2b5   :  { %414 = vst [vmem:[%s649_s7] sm:$0xff] %v409_v40  ;;  %v491_v43 = vpop.f32.mrb[11].mxu0 }

</bundles_post_ra>
